<compile_context>
chip_gen: v7x
topology: tpu7x:2x2x1
jax: 0.10.0
libtpu: 0.0.40
codegen_flags: <defaults>
</compile_context>

<pallas_src>
import numpy as np
import jax
import jax.numpy as jnp
from jax import lax
from jax.experimental import pallas as pl
from jax.experimental.pallas import tpu as pltpu


# ---------------------------------------------------------------------------
# Host-side (numpy) construction of weight / structural matrices
# ---------------------------------------------------------------------------

def _interp_matrix(n_in, n_out):
    """1-D interpolation matrix of nn.Upsample(mode='bilinear', align_corners=True)."""
    M = np.zeros((n_out, n_in), np.float32)
    for i in range(n_out):
        src = i * (n_in - 1) / (n_out - 1) if n_out > 1 else 0.0
        i0 = int(np.floor(src))
        i1 = min(i0 + 1, n_in - 1)
        f = src - i0
        M[i, i0] += 1.0 - f
        M[i, i1] += f
    return M


def _conv_band_matrix(w, W):
    """PyTorch (Cout, Cin, 3, 3) weights -> banded (W*Cin, 3*W*Cout) matrix.

    Column block dy holds, for every output column, the three horizontal taps
    (horizontal zero padding folded into the band):
      B[dy][w_in*Cin + ci, w_out*Cout + co] = w[co, ci, dy, w_in - w_out + 1]
    """
    w = np.asarray(w, np.float32)
    Cout, Cin = w.shape[0], w.shape[1]
    B = np.zeros((3, W * Cin, W * Cout), np.float32)
    for dy in range(3):
        for w_out in range(W):
            for dx in range(3):
                w_in = w_out + dx - 1
                if 0 <= w_in < W:
                    B[dy, w_in * Cin:(w_in + 1) * Cin,
                      w_out * Cout:(w_out + 1) * Cout] = w[:, :, dy, dx].T
    return np.concatenate([B[0], B[1], B[2]], axis=1)


def _pool_w_matrices(W, C):
    """Even/odd column-group (width C) selectors: two (W*C, (W//2)*C) matrices."""
    sel = np.zeros((2, W * C, (W // 2) * C), np.float32)
    for w2 in range(W // 2):
        for c in range(C):
            sel[0, (2 * w2) * C + c, w2 * C + c] = 1.0
            sel[1, (2 * w2 + 1) * C + c, w2 * C + c] = 1.0
    return sel[0], sel[1]


def _pool_h_matrix(N, H):
    """Packed [even-rows ; odd-rows] row selector: (N*H, N*H); top half = even rows."""
    half = N * (H // 2)
    sel = np.zeros((2 * half, N * H), np.float32)
    for n in range(N):
        for h2 in range(H // 2):
            sel[n * (H // 2) + h2, n * H + 2 * h2] = 1.0
            sel[half + n * (H // 2) + h2, n * H + 2 * h2 + 1] = 1.0
    return sel


def _upsample_w_matrix(W, C):
    """(W*C, 2*W*C): out[.., j*C+c] = sum_w Kx[j, w] * in[.., w*C+c]."""
    Kx = _interp_matrix(W, 2 * W)                       # (2W, W)
    return np.kron(Kx.T, np.eye(C, dtype=np.float32)).astype(np.float32)


def _upsample_h_matrix(N, H):
    """(N*2H, N*H): block-diagonal per-sample row interpolation."""
    Ky = _interp_matrix(H, 2 * H)                       # (2H, H)
    U = np.zeros((N * 2 * H, N * H), np.float32)
    for n in range(N):
        U[n * 2 * H:(n + 1) * 2 * H, n * H:(n + 1) * H] = Ky
    return U


def _bn_sum_bcast(W, C):
    """S_sum (W*C, C) sums the W lane groups per channel; S_bc = S_sum.T broadcasts back."""
    s = np.kron(np.ones((W, 1), np.float32), np.eye(C, dtype=np.float32))
    return s.astype(np.float32), s.T.copy().astype(np.float32)


def _pack_row_blocks(entries, width):
    """Pack [(name, 2-D array)] into one (rows, width) slab of 8-row-aligned blocks.

    Returns (slab, {name: (row_offset, rows, cols)}) so the kernel slices every
    matrix with static, sublane-aligned ref indexing (single large DMA per slab).
    """
    layout, blocks, off = {}, [], 0
    for name, a in entries:
        a = np.asarray(a, np.float32)
        r, c = a.shape
        assert c <= width, (name, a.shape, width)
        blk = np.zeros((((r + 7) // 8) * 8, width), np.float32)
        blk[:r, :c] = a
        layout[name] = (off, r, c)
        blocks.append(blk)
        off += blk.shape[0]
    return np.concatenate(blocks, axis=0), layout


# ---------------------------------------------------------------------------
# One-time probe of pltpu.roll's rotation direction (sublane rolls replace the
# vertical-tap shift matmuls; this pins the sign convention of the rotate op).
# ---------------------------------------------------------------------------

_ROLL_IS_NUMPY = None


def _roll_is_numpy_convention():
    global _ROLL_IS_NUMPY
    if _ROLL_IS_NUMPY is None:
        def k(x_ref, o_ref):
            o_ref[...] = pltpu.roll(x_ref[...], 1, 0)
        x = jnp.tile(jnp.arange(8, dtype=jnp.float32)[:, None], (1, 128))
        y = pl.pallas_call(k, out_shape=jax.ShapeDtypeStruct((8, 128), jnp.float32))(x)
        # numpy convention: out[r] = in[r-1]  =>  out[1, 0] == 0
        _ROLL_IS_NUMPY = bool(np.asarray(y)[1, 0] == 0.0)
    return _ROLL_IS_NUMPY


# ---------------------------------------------------------------------------
# Fused kernel builder
# ---------------------------------------------------------------------------

def _build_unet_call(params, N):
    """Pack operands into 3 slabs and return callable(x_flat)->(N*16, 128) slab."""
    P = {k: {kk: np.asarray(vv, np.float32) for kk, vv in v.items()}
         for k, v in params.items()}

    # --- encoder conv bands (auto-DMA'd to VMEM) ---------------------------
    enc_slab, enc_l = _pack_row_blocks([
        ("enc0", _conv_band_matrix(P["enc0"]["w"], 16)),        # (48, 384)
        ("enc1", _conv_band_matrix(P["enc1"]["w"], 8)),         # (64, 384)
        ("enc2", _conv_band_matrix(P["enc2"]["w"], 4)),         # (64, 384)
    ], 384)

    # --- decoder conv bands (manual DMA, overlapped with the encoder) ------
    # Bilinear width interpolation is folded host-side into the "up" bands
    # (uw @ band); the skip/up channel concat is never materialized.
    def fused_up_band(w_up, Wres, C_up):
        uw = _upsample_w_matrix(Wres // 2, C_up).astype(np.float64)
        band = _conv_band_matrix(w_up, Wres).astype(np.float64)
        return (uw @ band).astype(np.float32)                   # (Wres/2*C_up, 384)

    dec_slab, dec_l = _pack_row_blocks([
        ("dec1_skip", _conv_band_matrix(P["dec1"]["w"][:, :16], 8)),    # (128, 384)
        ("dec1_up",   fused_up_band(P["dec1"]["w"][:, 16:], 8, 32)),    # (128, 384)
        ("dec0_skip", _conv_band_matrix(P["dec0"]["w"][:, :8], 16)),    # (128, 384)
        ("dec0_up",   fused_up_band(P["dec0"]["w"][:, 8:], 16, 16)),    # (128, 384)
    ], 384)

    # --- misc structural matrices + BN affine params (auto-DMA'd) ----------
    # NOTE: conv bias dropped on purpose — training-mode BatchNorm is exactly
    # invariant to a per-channel constant added before it.
    ssum0, sbc0 = _bn_sum_bcast(16, 8)
    ssum1, sbc1 = _bn_sum_bcast(8, 16)
    ssum2, sbc2 = _bn_sum_bcast(4, 32)
    pe0, po0 = _pool_w_matrices(16, 8)
    pe1, po1 = _pool_w_matrices(8, 16)
    misc_slab, misc_l = _pack_row_blocks([
        ("gb_enc0", np.stack([P["enc0"]["gamma"], P["enc0"]["beta"]])),
        ("gb_enc1", np.stack([P["enc1"]["gamma"], P["enc1"]["beta"]])),
        ("gb_enc2", np.stack([P["enc2"]["gamma"], P["enc2"]["beta"]])),
        ("gb_dec1", np.stack([P["dec1"]["gamma"], P["dec1"]["beta"]])),
        ("gb_dec0", np.stack([P["dec0"]["gamma"], P["dec0"]["beta"]])),
        ("ssum0", ssum0), ("ssum1", ssum1), ("ssum2", ssum2),
        ("sbc0", sbc0), ("sbc1", sbc1), ("sbc2", sbc2),
        ("pe0", pe0), ("po0", po0), ("pe1", pe1), ("po1", po1),
        ("ph0", _pool_h_matrix(N, 16)),       # (2N*8, 2N*8)
        ("ph1", _pool_h_matrix(N, 8)),        # (2N*4, 2N*4)
        ("uh1", _upsample_h_matrix(N, 4)),    # (N*8, N*4)
        ("uh0", _upsample_h_matrix(N, 8)),    # (N*16, N*8)
    ], 128)

    rows16, rows8, rows4 = 16 * N, 8 * N, 4 * N
    numpy_roll = _roll_is_numpy_convention()
    sh_dn = lambda rows: 1 if numpy_roll else rows - 1      # out[r] = in[r-1]
    sh_up = lambda rows: rows - 1 if numpy_roll else 1      # out[r] = in[r+1]

    def kernel(x_ref, encw_ref, misc_ref, decw_hbm, o_ref, decw_ref, dma_sem):
        # Kick off the decoder-band DMA; it is hidden behind the encoder compute.
        dec_cp = pltpu.make_async_copy(decw_hbm, decw_ref, dma_sem.at[0])
        dec_cp.start()

        def view(ref, layout, name):
            off, r, c = layout[name]
            return ref[off:off + r, :c]

        misc = lambda n: view(misc_ref, misc_l, n)
        encw = lambda n: view(encw_ref, enc_l, n)
        decw = lambda n: view(decw_ref, dec_l, n)

        def conv_bn_relu(z, rows, hh, gb, s_sum, s_bc, inv_n):
            """Vertical 3-tap accumulation + BatchNorm(train) + ReLU.

            z: (rows, 384) = [dy=0 | dy=1 | dy=2] horizontal-tap partials from the
            banded matmul(s); vertical taps are sublane rolls (XLU) with per-sample
            boundary masks (VPU) — off the serial MXU chain.
            """
            z0, z1, z2 = z[:, :128], z[:, 128:256], z[:, 256:384]
            h_id = lax.broadcasted_iota(jnp.int32, (rows, 128), 0) & (hh - 1)
            y = (z1
                 + jnp.where(h_id != 0, pltpu.roll(z0, sh_dn(rows), 0), 0.0)
                 + jnp.where(h_id != hh - 1, pltpu.roll(z2, sh_up(rows), 0), 0.0))
            # BatchNorm2d with batch statistics, fused: one pass for sum / sum-sq,
            # 2-row stacked matmuls for the channel reduce & broadcast, EUP rsqrt,
            # fused affine + ReLU.
            s12 = jnp.concatenate([jnp.sum(y, axis=0, keepdims=True),
                                   jnp.sum(y * y, axis=0, keepdims=True)], axis=0)
            mom = jnp.dot(s12, s_sum, preferred_element_type=jnp.float32) * inv_n
            mean, ex2 = mom[0:1], mom[1:2]
            var = jnp.maximum(ex2 - mean * mean, 0.0)       # guard f32 cancellation
            scale = gb[0:1] * lax.rsqrt(var + 1e-5)
            shift = gb[1:2] - mean * scale
            ss = jnp.dot(jnp.concatenate([scale, shift], axis=0), s_bc,
                         preferred_element_type=jnp.float32)            # (2, 128)
            return jnp.maximum(y * ss[0:1] + ss[1:2], 0.0)

        def maxpool2(y, pe, po, ph, rows):
            """2x2 max pool on a row-flat slab: even/odd column-group selection
            matmuls + one packed [even;odd] row-selection matmul + aligned half max."""
            yw = jnp.maximum(jnp.dot(y, pe, preferred_element_type=jnp.float32),
                             jnp.dot(y, po, preferred_element_type=jnp.float32))
            r = jnp.dot(ph, yw, preferred_element_type=jnp.float32)
            half = rows // 2
            return jnp.maximum(r[:half], r[half:])

        x = x_ref[...]                                              # (N*16, 48)
        # ------------------------------ encoder ------------------------------
        f0 = conv_bn_relu(
            jnp.dot(x, encw("enc0"), preferred_element_type=jnp.float32),
            rows16, 16, misc("gb_enc0"), misc("ssum0"), misc("sbc0"),
            1.0 / (rows16 * 16))                                    # (N*16, 128)
        p1 = maxpool2(f0, misc("pe0"), misc("po0"), misc("ph0"), rows16)   # (N*8, 64)
        f1 = conv_bn_relu(
            jnp.dot(p1, encw("enc1"), preferred_element_type=jnp.float32),
            rows8, 8, misc("gb_enc1"), misc("ssum1"), misc("sbc1"),
            1.0 / (rows8 * 8))                                      # (N*8, 128)
        p2 = maxpool2(f1, misc("pe1"), misc("po1"), misc("ph1"), rows8)    # (N*4, 64)
        f2 = conv_bn_relu(
            jnp.dot(p2, encw("enc2"), preferred_element_type=jnp.float32),
            rows4, 4, misc("gb_enc2"), misc("ssum2"), misc("sbc2"),
            1.0 / (rows4 * 4))                                      # (N*4, 128)
        # ------------------------------ decoder ------------------------------
        dec_cp.wait()                                  # decoder bands now in VMEM
        # skip + bilinearly-upsampled contributions; width interpolation is folded
        # into the band, height interpolation is the tiny uh matmul.
        z = (jnp.dot(f1, decw("dec1_skip"), preferred_element_type=jnp.float32)
             + jnp.dot(misc("uh1"),
                       jnp.dot(f2, decw("dec1_up"), preferred_element_type=jnp.float32),
                       preferred_element_type=jnp.float32))
        h = conv_bn_relu(z, rows8, 8, misc("gb_dec1"), misc("ssum1"), misc("sbc1"),
                         1.0 / (rows8 * 8))                         # (N*8, 128)
        z = (jnp.dot(f0, decw("dec0_skip"), preferred_element_type=jnp.float32)
             + jnp.dot(misc("uh0"),
                       jnp.dot(h, decw("dec0_up"), preferred_element_type=jnp.float32),
                       preferred_element_type=jnp.float32))
        o_ref[...] = conv_bn_relu(z, rows16, 16, misc("gb_dec0"), misc("ssum0"),
                                  misc("sbc0"), 1.0 / (rows16 * 16))   # (N*16, 128)

    call = pl.pallas_call(
        kernel,
        out_shape=jax.ShapeDtypeStruct((rows16, 128), jnp.float32),
        in_specs=[
            pl.BlockSpec(memory_space=pltpu.MemorySpace.VMEM),   # x (row-flat)
            pl.BlockSpec(memory_space=pltpu.MemorySpace.VMEM),   # encoder band slab
            pl.BlockSpec(memory_space=pltpu.MemorySpace.VMEM),   # misc slab
            pl.BlockSpec(memory_space=pl.ANY),                   # decoder band slab (manual DMA)
        ],
        out_specs=pl.BlockSpec(memory_space=pltpu.MemorySpace.VMEM),
        scratch_shapes=[pltpu.VMEM(dec_slab.shape, jnp.float32),
                        pltpu.SemaphoreType.DMA((1,))],
        compiler_params=pltpu.CompilerParams(vmem_limit_bytes=8 * 1024 * 1024),
    )

    enc_slab = jnp.asarray(enc_slab)
    misc_slab = jnp.asarray(misc_slab)
    dec_slab = jnp.asarray(dec_slab)
    return lambda x_flat: call(x_flat, enc_slab, misc_slab, dec_slab)


# ---------------------------------------------------------------------------
# Wrapper
# ---------------------------------------------------------------------------

def unet_forward(x_nchw, params):
    """UNet forward: (N, 3, 16, 16) NCHW -> (N, 8, 16, 16) NCHW."""
    N, Cin, H, W = x_nchw.shape
    assert (Cin, H, W) == (3, 16, 16)
    # Layout glue only: NCHW -> lane-dense row-flat slab (N*H, W*Cin).
    x_flat = jnp.transpose(x_nchw, (0, 2, 3, 1)).reshape(N * H, W * Cin)
    out_flat = _build_unet_call(params, N)(x_flat)
    return jnp.transpose(out_flat.reshape(N, H, W, 8), (0, 3, 1, 2))


# ---------------------------------------------------------------------------
# Plain-JAX reference (independent path; keeps the conv bias and checks that
# it is indeed absorbed by training-mode BatchNorm)
# ---------------------------------------------------------------------------

def ref_single_conv(x, p):
    y = jax.lax.conv_general_dilated(
        x, jnp.transpose(p["w"], (2, 3, 1, 0)), (1, 1), "SAME",
        dimension_numbers=("NHWC", "HWIO", "NHWC")) + p["b"]
    mean = y.mean(axis=(0, 1, 2), keepdims=True)
    var = ((y - mean) ** 2).mean(axis=(0, 1, 2), keepdims=True)
    y = (y - mean) / jnp.sqrt(var + 1e-5) * p["gamma"] + p["beta"]
    return jnp.maximum(y, 0.0)


def ref_maxpool2(x):
    N, H, W, C = x.shape
    return jnp.max(x.reshape(N, H // 2, 2, W // 2, 2, C), axis=(2, 4))


def ref_up2(x):
    N, H, W, C = x.shape
    Wy = jnp.asarray(_interp_matrix(H, 2 * H))
    Wx = jnp.asarray(_interp_matrix(W, 2 * W))
    return jnp.einsum("ih,jw,nhwc->nijc", Wy, Wx, x)


def unet_ref(x_nchw, params):
    x = jnp.transpose(x_nchw, (0, 2, 3, 1))
    f0 = ref_single_conv(x, params["enc0"])
    f1 = ref_single_conv(ref_maxpool2(f0), params["enc1"])
    f2 = ref_single_conv(ref_maxpool2(f1), params["enc2"])
    h = ref_single_conv(jnp.concatenate([f1, ref_up2(f2)], axis=-1), params["dec1"])
    out = ref_single_conv(jnp.concatenate([f0, ref_up2(h)], axis=-1), params["dec0"])
    return jnp.transpose(out, (0, 3, 1, 2))


# ---------------------------------------------------------------------------
# Deterministic parameter init + self-check
# ---------------------------------------------------------------------------

def make_conv_params(key, cin, cout):
    k1, k2, k3, k4 = jax.random.split(key, 4)
    scale = 1.0 / np.sqrt(cin * 9)
    return {
        "w": jax.random.uniform(k1, (cout, cin, 3, 3), jnp.float32, -scale, scale),
        "b": jax.random.uniform(k2, (cout,), jnp.float32, -scale, scale),
        "gamma": 1.0 + 0.1 * jax.random.normal(k3, (cout,), jnp.float32),
        "beta": 0.1 * jax.random.normal(k4, (cout,), jnp.float32),
    }


if __name__ == "__main__":
    key = jax.random.PRNGKey(0)
    kx, k0, k1, k2, k3, k4 = jax.random.split(key, 6)

    # N=2, in_channels=3, H=W=16, channels=[8, 16, 32]  (NCHW, like PyTorch)
    x = jax.random.normal(kx, (2, 3, 16, 16), jnp.float32)

    params = {
        "enc0": make_conv_params(k0, 3, 8),          # in_conv
        "enc1": make_conv_params(k1, 8, 16),         # UNetDown 1
        "enc2": make_conv_params(k2, 16, 32),        # UNetDown 2
        "dec1": make_conv_params(k3, 16 + 32, 16),   # UNetUp (deepest)
        "dec0": make_conv_params(k4, 8 + 16, 8),     # UNetUp (shallowest)
    }

    out = jax.block_until_ready(unet_forward(x, params))
    assert out.shape == (2, 8, 16, 16), out.shape

    ref = jax.block_until_ready(unet_ref(x, params))
    np.testing.assert_allclose(np.asarray(out), np.asarray(ref),
                               rtol=1e-3, atol=1e-3)
    print("KERNEL_OK")
</pallas_src>

<mosaic_0001>
module attributes {stable_mosaic.version = 11 : i64} {
  func.func @k(%arg0: memref<8x128xf32, #tpu.memory_space<vmem>>, %arg1: memref<8x128xf32, #tpu.memory_space<vmem>>) attributes {dimension_semantics = [], scalar_prefetch = 0 : i64, scratch_operands = 0 : i64, tpu.core_type = #tpu.core_type<tc>} {
    %c0 = arith.constant 0 : index
    %c0_0 = arith.constant 0 : index
    %0 = vector.load %arg0[%c0, %c0_0] : memref<8x128xf32, #tpu.memory_space<vmem>>, vector<8x128xf32>
    %c1_i32 = arith.constant 1 : i32
    %1 = tpu.dynamic_rotate %0 by %c1_i32 dim 0 : vector<8x128xf32>, i32 -> vector<8x128xf32>
    %c0_1 = arith.constant 0 : index
    %c0_2 = arith.constant 0 : index
    %2 = vector.load %arg1[%c0_1, %c0_2] : memref<8x128xf32, #tpu.memory_space<vmem>>, vector<8x128xf32>
    tpu.vector_store %arg1[%c0_1, %c0_2], %1 {strides = array<i32>} : memref<8x128xf32, #tpu.memory_space<vmem>>, vector<8x128xf32>,
    return
  }
}

</mosaic_0001>

<bundles_post_ra>
// kernel: tpu_custom_call.1
= control target key start
LH: loop header
LB: loop body
LE: loop exit
PB: predicated region body
PF: predicated region fallthrough
CT: control target
= control target key end

     0   :  { %6 = vsyncpa [#allocation3], 0  ;;  %s125_s0 = inlined_call_operand.hbm [shape: f32[8,128], index: 0, kind: input, shape index: {}]   ;;  %s126_s1 = inlined_call_operand.hbm [shape: f32[8,128], index: 1, kind: output, shape index: {}]  }
   0x1   :  { %7 = vsyncpa [#allocation4], 0  ;;  %s89_s6 = smov [#allocation2]   ;;  %s41_s10 = scalar_lea.hbm %s125_s0, 128 }
   0x2   :  { %s14_s7 = sshll.u32 %s89_s6, 4  ;;  %p42_p0 = scmp.ne.s32.totalorder %s125_s0, %s41_s10  ;;  %s15_s7 = int_to_ptr.vmem [resolvable:$true] %s14_s7 }
   0x3   :  { %p45_p1 = scmp.lt.u32.totalorder %s41_s10, %s125_s0 }
   0x5   :  { %p47_p2 = pnand %p45_p1, %p42_p0 }
   0x7   :  { %50 = shalt.err (!%p47_p2)
}
   0x8   :  { %s51_s15 = scalar_lea.vmem %s15_s7, 128  ;;  %p56_p4 = scmp.lt.s32.totalorder %s15_s7, %s15_s7 }
   0x9   :  { %p52_p3 = scmp.ne.s32.totalorder %s15_s7, %s51_s15  ;;  %p57_p5 = scmp.lt.s32.totalorder %s51_s15, %s51_s15 }
   0xb   :  { %p58_p6 = por %p57_p5, %p56_p4 }
   0xd   :  { %p59_p7 = pnand %p58_p6, %p52_p3 }
   0xf   :  { %62 = shalt.err (!%p59_p7)
}
  0x10   :  { %17 = dma.hbm_to_vmem [thread:$0]  %s125_s0, 128, %s15_s7, [#allocation3]  }
  0x11   :  { %85 = dma.done.wait [#allocation3], 128  }
  0x12   :  { %86 = vsyncadd [#allocation3], 4294967168  ;;  %s90_s18 = smov [#allocation5]   ;;  %v21_v0 = vld [vmem:[#allocation2] sm:$0xff] }
  0x13   :  { %s30_s19 = sshll.u32 %s90_s18, 4  ;;  %v22_v1 = vrot.slane %v21_v0, 7  ;;  %s31_s19 = int_to_ptr.vmem [resolvable:$true] %s30_s19 }
  0x14   :  { %s63_s20 = scalar_lea.vmem %s31_s19, 128  ;;  %p68_p9 = scmp.lt.s32.totalorder %s31_s19, %s31_s19 }
  0x15   :  { %23 = vst [vmem:[#allocation5] sm:$0xff] %v22_v1  ;;  %p64_p8 = scmp.ne.s32.totalorder %s31_s19, %s63_s20  ;;  %p69_p10 = scmp.lt.s32.totalorder %s63_s20, %s63_s20 }
  0x17   :  { %p70_p11 = por %p69_p10, %p68_p9 }
  0x19   :  { %p71_p12 = pnand %p70_p11, %p64_p8 }
  0x1b   :  { %74 = shalt.err (!%p71_p12)
}
  0x1c   :  { %s75_s23 = scalar_lea.hbm %s126_s1, 128 }
  0x1d   :  { %p76_p13 = scmp.ne.s32.totalorder %s126_s1, %s75_s23  ;;  %p79_p0 = scmp.lt.u32.totalorder %s75_s23, %s126_s1 }
  0x1f   :  { %p81_p1 = pnand %p79_p0, %p76_p13 }
  0x21   :  { %84 = shalt.err (!%p81_p1)
}
  0x22   :  { %33 = dma.vmem_to_hbm [thread:$0]  %s31_s19, 128, %s126_s1, [#allocation4]  }
  0x23   :  { %87 = dma.done.wait [#allocation4], 128  }
  0x24   :  { %88 = vsyncadd [#allocation4], 4294967168 }
  0x25   :  { %37 = vsyncpa [#allocation3], 1 }
  0x26   :  { %38 = vsyncpa [#allocation4], 1 }

</bundles_post_ra>
